<compile_context>
chip_gen: v5e
topology: v5e:2x2
jax: 0.10.0
libtpu: 0.0.40
codegen_flags: <defaults>
</compile_context>

<pallas_src>
import functools

import jax
import jax.numpy as jnp
from jax.experimental import pallas as pl
from jax.experimental.pallas import tpu as pltpu

ALPHA = 0.25
GAMMA = 2.0
IGNORE_INDEX = -100


def _vmem_capacity_bytes():
    """Per-core VMEM bytes; falls back to the smallest current part (v7x)."""
    try:
        return int(pltpu.get_tpu_info().vmem_capacity_bytes)
    except Exception:
        return 64 * 1024 * 1024


def _budgets():
    """(f32 bytes per logits block, vmem_limit_bytes), derived per generation.

    The kernel holds ~2x the (double-buffered) input block plus ~5-6 live f32
    (nb, C, tile_s) intermediates (upcast x, exp, iota, onehot, masked temp),
    i.e. roughly a 7x multiplier on the f32 block, so keep the f32 block near
    cap/32 and raise the scoped-VMEM limit well above that footprint.
    """
    cap = _vmem_capacity_bytes()
    f32_block = max(1 << 20, min(4 << 20, cap // 32))      # 2 MiB on v7x, 4 MiB on v5e/v6e
    vmem_limit = int(min(cap * 5 // 8, 64 << 20))          # 40 MiB on v7x, 64 MiB on v5e/v6e
    return f32_block, vmem_limit


def _focal_weight(one_minus_pt, gamma):
    if gamma == 2:                                  # fast path: one VPU multiply
        return one_minus_pt * one_minus_pt
    if float(gamma) == int(gamma) and gamma >= 0:   # small integer gamma: unrolled muls
        w = jnp.ones_like(one_minus_pt)
        for _ in range(int(gamma)):
            w = w * one_minus_pt
        return w
    return jnp.power(one_minus_pt, float(gamma))    # arg >= 0 -> pow is NaN-safe


# ----------------------------------------------------------------------------
# (N, C, S) segmentation path: classes on sublanes, spatial on lanes.
# ----------------------------------------------------------------------------
def _focal_loss_spatial_kernel(logits_ref, tgt_ref, out_ref, *, alpha, gamma,
                               ignore_index, n_total, s_total,
                               mask_n_tail, mask_s_tail):
    x = logits_ref[...].astype(jnp.float32)        # (nb, C, T)
    t = tgt_ref[...]                               # (nb, 1, T) int32

    # Numerically stable log-sum-exp over the class (sublane) axis.
    m = jnp.max(x, axis=1, keepdims=True)                      # (nb, 1, T)
    sumexp = jnp.sum(jnp.exp(x - m), axis=1, keepdims=True)    # (nb, 1, T)

    # Target-class logit via iota + select (VPU) + one sublane reduce (XLU).
    cls = jax.lax.broadcasted_iota(jnp.int32, x.shape, 1)
    tgt_logit = jnp.sum(jnp.where(cls == t, x, 0.0), axis=1, keepdims=True)

    valid = t != ignore_index                                  # (nb, 1, T)
    if mask_s_tail:
        # Last spatial tile may overrun S: those columns hold garbage.
        pos = (pl.program_id(1) * t.shape[-1]
               + jax.lax.broadcasted_iota(jnp.int32, t.shape, 2))
        valid = jnp.logical_and(valid, pos < s_total)
    if mask_n_tail:
        # Last batch block may overrun N: those rows hold garbage.
        row = (pl.program_id(0) * t.shape[0]
               + jax.lax.broadcasted_iota(jnp.int32, t.shape, 0))
        valid = jnp.logical_and(valid, row < n_total)

    ce = jnp.maximum(m + jnp.log(sumexp) - tgt_logit, 0.0)     # (nb, 1, T)
    # pt = exp(-ce) on the single (nb,1,T) row: one EUP op on the free EUP
    # slot instead of a second (C,T) masked gather + sublane reduce.
    pt = jnp.exp(-ce)
    omp = jnp.maximum(1.0 - pt, 0.0)
    # Select quashes any NaN/inf produced from garbage tail rows/columns.
    fl = jnp.where(valid, alpha * _focal_weight(omp, gamma) * ce, 0.0)

    fl = jnp.sum(fl, axis=0)                                   # (1, T): fold batch rows

    # Lane-preserving tree reduce: fold T columns into one 128-lane partial
    # using log2-depth adds on vreg-aligned static slices (no cross-lane work).
    chunks = [fl[:, k * 128:(k + 1) * 128] for k in range(fl.shape[-1] // 128)]
    while len(chunks) > 1:
        nxt = [chunks[i] + chunks[i + 1] for i in range(0, len(chunks) - 1, 2)]
        if len(chunks) % 2:
            nxt.append(chunks[-1])
        chunks = nxt
    out_ref[0] = chunks[0]                                     # (1, 128) lane-dense store


def _focal_loss_spatial(x, t, alpha, gamma, ignore_index, tile_s,
                        f32_block_budget, vmem_limit):
    n, c, s = x.shape

    # Columns (= nb * tile_s) per block from the f32 VMEM budget.
    cols_budget = max(128, (f32_block_budget // 4) // max(c, 1) // 128 * 128)
    if tile_s is None:
        tile_s = cols_budget
    tile_s = max(128,
                 min(int(tile_s), cols_budget, pl.cdiv(s, 128) * 128) // 128 * 128)
    nb = max(1, min(n, cols_budget // tile_s))     # batch blocking for small S

    def cells(nb_, ts_):
        return pl.cdiv(n, nb_) * pl.cdiv(s, ts_)

    # Megacore: guarantee >=2 grid cells (hard) and aim for >=8 (soft) without
    # dropping a step below ~4096 columns (keeps the ~0.35us/step cost hidden).
    while cells(nb, tile_s) < 8:
        if nb > 1:
            nb = (nb + 1) // 2
        elif tile_s > 128 and (tile_s // 2 // 128 * 128 >= 4096
                               or cells(nb, tile_s) < 2):
            tile_s = max(128, tile_s // 2 // 128 * 128)
        else:
            break

    n_b_tiles = pl.cdiv(n, nb)
    n_s_tiles = pl.cdiv(s, tile_s)

    kernel = functools.partial(
        _focal_loss_spatial_kernel, alpha=float(alpha), gamma=gamma,
        ignore_index=int(ignore_index), n_total=n, s_total=s,
        mask_n_tail=(n % nb) != 0, mask_s_tail=(s % tile_s) != 0)

    partial_sums = pl.pallas_call(
        kernel,
        out_shape=jax.ShapeDtypeStruct((n_b_tiles, 1, n_s_tiles * 128),
                                       jnp.float32),
        grid_spec=pltpu.PrefetchScalarGridSpec(
            num_scalar_prefetch=0,
            grid=(n_b_tiles, n_s_tiles),
            # NOTE: bump the logits spec to pipeline_mode=pl.Buffered(3) only
            # if traces show exposed DMA at step boundaries (needs headroom).
            in_specs=[pl.BlockSpec((nb, c, tile_s), lambda b, si: (b, 0, si)),
                      pl.BlockSpec((nb, 1, tile_s), lambda b, si: (b, 0, si))],
            out_specs=pl.BlockSpec((1, 1, 128), lambda b, si: (b, 0, si)),
        ),
        compiler_params=pltpu.CompilerParams(
            dimension_semantics=("parallel", "parallel"),
            vmem_limit_bytes=vmem_limit),
    )(x, t)

    # Ignored positions contribute exactly 0 but stay in the divisor, matching
    # torch.mean over the unreduced focal-loss map.
    return jnp.sum(partial_sums) / (n * s)


# ----------------------------------------------------------------------------
# (N, C) classification path: rows on sublanes, classes on lanes (no wrapper
# transpose copy; softmax reductions use the otherwise-idle lane/XLU axis).
# ----------------------------------------------------------------------------
def _focal_loss_rows_kernel(logits_ref, tgt_ref, out_ref, *, alpha, gamma,
                            ignore_index):
    x = logits_ref[...].astype(jnp.float32)       # (TN, C)
    t = tgt_ref[...]                              # (TN, 1) int32

    m = jnp.max(x, axis=-1, keepdims=True)
    sumexp = jnp.sum(jnp.exp(x - m), axis=-1, keepdims=True)
    cls = jax.lax.broadcasted_iota(jnp.int32, x.shape, 1)
    tgt_logit = jnp.sum(jnp.where(cls == t, x, 0.0), axis=-1, keepdims=True)

    valid = t != ignore_index
    ce = jnp.maximum(m + jnp.log(sumexp) - tgt_logit, 0.0)
    pt = jnp.exp(-ce)
    omp = jnp.maximum(1.0 - pt, 0.0)
    # Per-row focal loss; rows are independent so block-tail garbage rows
    # cannot contaminate valid rows (their writes are clipped by Pallas).
    out_ref[...] = jnp.where(valid, alpha * _focal_weight(omp, gamma) * ce, 0.0)


def _focal_loss_rows(preds, targets, alpha, gamma, ignore_index,
                     f32_block_budget, vmem_limit):
    n_rows, c = preds.shape
    t = targets.reshape(n_rows, 1).astype(jnp.int32)

    rows_budget = max(8, (f32_block_budget // 4) // max(c, 1) // 8 * 8)
    tile_n = min(rows_budget, n_rows)
    if tile_n < n_rows:
        tile_n = max(8, tile_n // 8 * 8)
    elif n_rows >= 16:
        tile_n = max(8, (n_rows // 2) // 8 * 8)   # >=2 grid cells for megacore
    n_tiles = pl.cdiv(n_rows, tile_n)

    kernel = functools.partial(_focal_loss_rows_kernel, alpha=float(alpha),
                               gamma=gamma, ignore_index=int(ignore_index))

    per_row = pl.pallas_call(
        kernel,
        out_shape=jax.ShapeDtypeStruct((n_rows, 1), jnp.float32),
        grid_spec=pltpu.PrefetchScalarGridSpec(
            num_scalar_prefetch=0,
            grid=(n_tiles,),
            in_specs=[pl.BlockSpec((tile_n, c), lambda i: (i, 0)),
                      pl.BlockSpec((tile_n, 1), lambda i: (i, 0))],
            out_specs=pl.BlockSpec((tile_n, 1), lambda i: (i, 0)),
        ),
        compiler_params=pltpu.CompilerParams(
            dimension_semantics=("parallel",),
            vmem_limit_bytes=vmem_limit),
    )(preds, t)

    return jnp.sum(per_row) / n_rows


# ----------------------------------------------------------------------------
# Public entry point.
# ----------------------------------------------------------------------------
def focal_loss(preds, targets, alpha=ALPHA, gamma=GAMMA,
               ignore_index=IGNORE_INDEX, tile_s=None):
    """Mean focal loss.

    preds:   (N, C) or (N, C, *spatial) float (f32 or bf16 -- passed through
             as-is, the kernel upcasts; bf16 halves HBM traffic on v5e/v6e).
    targets: (N,) or (N, *spatial) integer labels, ignore_index allowed.
    """
    # TODO(synk): only the module's default reduction='mean' is wired up here.
    f32_block_budget, vmem_limit = _budgets()
    if preds.ndim >= 3:
        n, c = preds.shape[0], preds.shape[1]
        s = 1
        for d in preds.shape[2:]:
            s *= d
        x = preds.reshape(n, c, s)                       # free contiguous reshape
        t = targets.reshape(n, 1, s).astype(jnp.int32)
        return _focal_loss_spatial(x, t, alpha, gamma, ignore_index, tile_s,
                                   f32_block_budget, vmem_limit)
    return _focal_loss_rows(preds, targets, alpha, gamma, ignore_index,
                            f32_block_budget, vmem_limit)


def focal_loss_ref(preds, targets, alpha=ALPHA, gamma=GAMMA,
                   ignore_index=IGNORE_INDEX):
    """Pure-JAX reference matching F.cross_entropy(..., reduction='none') + focal."""
    c = preds.shape[1]
    x = jnp.moveaxis(preds, 1, -1).reshape(-1, c).astype(jnp.float32)
    t = targets.reshape(-1)
    logp = jax.nn.log_softmax(x, axis=-1)
    valid = t != ignore_index
    t_safe = jnp.where(valid, t, 0)
    ce = -jnp.take_along_axis(logp, t_safe[:, None], axis=-1)[:, 0]
    ce = jnp.where(valid, ce, 0.0)
    pt = jnp.exp(-ce)
    fl = alpha * (1.0 - pt) ** gamma * ce
    return jnp.mean(fl)


if __name__ == "__main__":
    key = jax.random.PRNGKey(0)
    k1, k2, k3, k4, k5 = jax.random.split(key, 5)

    # Segmentation-style NCHW input (main path).
    N, C, H, W = 2, 4, 16, 16
    preds = jax.random.normal(k1, (N, C, H, W), dtype=jnp.float32)
    targets = jax.random.randint(k2, (N, H, W), 0, C, dtype=jnp.int32)
    ignore_mask = jax.random.bernoulli(k3, p=0.1, shape=(N, H, W))
    targets = jnp.where(ignore_mask, IGNORE_INDEX, targets)

    loss = jax.block_until_ready(jax.jit(focal_loss)(preds, targets))
    ref = jax.block_until_ready(focal_loss_ref(preds, targets))
    assert jnp.allclose(loss, ref, rtol=1e-5, atol=1e-6), (loss, ref)

    # Plain (N, C) classification input (transpose-free path).
    N2, C2 = 16, 8
    preds2 = jax.random.normal(k4, (N2, C2), dtype=jnp.float32)
    targets2 = jax.random.randint(k5, (N2,), 0, C2, dtype=jnp.int32)
    targets2 = targets2.at[0].set(IGNORE_INDEX)

    loss2 = jax.block_until_ready(jax.jit(focal_loss)(preds2, targets2))
    ref2 = jax.block_until_ready(focal_loss_ref(preds2, targets2))
    assert jnp.allclose(loss2, ref2, rtol=1e-5, atol=1e-6), (loss2, ref2)

    print("KERNEL_OK")
</pallas_src>

<mosaic_0001>
module attributes {stable_mosaic.version = 11 : i64} {
  func.func @_focal_loss_spatial_kernel(%arg0: i32, %arg1: i32, %arg2: memref<1x4x256xf32, #tpu.memory_space<vmem>>, %arg3: memref<1x1x256xi32, #tpu.memory_space<vmem>>, %arg4: memref<1x1x128xf32, #tpu.memory_space<vmem>>) attributes {dimension_semantics = [#tpu.dimension_semantics<parallel>, #tpu.dimension_semantics<parallel>], iteration_bounds = array<i64: 2, 1>, scalar_prefetch = 0 : i64, scratch_operands = 0 : i64, tpu.core_type = #tpu.core_type<tc>, window_params = [{transform_indices = @transform_0, window_bounds = array<i64: 1, 4, 256>}, {transform_indices = @transform_1, window_bounds = array<i64: 1, 1, 256>}, {transform_indices = @transform_2, window_bounds = array<i64: 1, 1, 128>}]} {
    %c0 = arith.constant 0 : index
    %c0_0 = arith.constant 0 : index
    %c0_1 = arith.constant 0 : index
    %0 = vector.load %arg2[%c0, %c0_0, %c0_1] : memref<1x4x256xf32, #tpu.memory_space<vmem>>, vector<1x4x256xf32>
    %c0_2 = arith.constant 0 : index
    %c0_3 = arith.constant 0 : index
    %c0_4 = arith.constant 0 : index
    %1 = vector.load %arg3[%c0_2, %c0_3, %c0_4] : memref<1x1x256xi32, #tpu.memory_space<vmem>>, vector<1x1x256xi32>
    %cst = arith.constant dense<0xFF800000> : vector<1x256xf32>
    %2 = vector.multi_reduction <maximumf>, %0, %cst [1] : vector<1x4x256xf32> to vector<1x256xf32>
    %3 = vector.shape_cast %2 : vector<1x256xf32> to vector<1x1x256xf32>
    %4 = vector.broadcast %3 : vector<1x1x256xf32> to vector<1x4x256xf32>
    %5 = arith.subf %0, %4 : vector<1x4x256xf32>
    %6 = math.exp %5 : vector<1x4x256xf32>
    %cst_5 = arith.constant dense<0.000000e+00> : vector<1x256xf32>
    %7 = vector.multi_reduction <add>, %6, %cst_5 [1] : vector<1x4x256xf32> to vector<1x256xf32>
    %8 = vector.shape_cast %7 : vector<1x256xf32> to vector<1x1x256xf32>
    %9 = tpu.iota {dimensions = array<i32: 1>} : vector<1x4x256xi32>
    %10 = vector.broadcast %1 : vector<1x1x256xi32> to vector<1x4x256xi32>
    %11 = arith.cmpi eq, %9, %10 : vector<1x4x256xi32>
    %cst_6 = arith.constant 0.000000e+00 : f32
    %12 = vector.broadcast %cst_6 : f32 to vector<1x4x256xf32>
    %13 = arith.select %11, %0, %12 : vector<1x4x256xi1>, vector<1x4x256xf32>
    %cst_7 = arith.constant dense<0.000000e+00> : vector<1x256xf32>
    %14 = vector.multi_reduction <add>, %13, %cst_7 [1] : vector<1x4x256xf32> to vector<1x256xf32>
    %15 = vector.shape_cast %14 : vector<1x256xf32> to vector<1x1x256xf32>
    %c-100_i32 = arith.constant -100 : i32
    %16 = vector.broadcast %c-100_i32 : i32 to vector<1x1x256xi32>
    %17 = arith.cmpi ne, %1, %16 : vector<1x1x256xi32>
    %18 = math.log %8 : vector<1x1x256xf32>
    %19 = arith.addf %3, %18 : vector<1x1x256xf32>
    %20 = arith.subf %19, %15 : vector<1x1x256xf32>
    %cst_8 = arith.constant 0.000000e+00 : f32
    %21 = vector.broadcast %cst_8 : f32 to vector<1x1x256xf32>
    %22 = arith.maximumf %20, %21 : vector<1x1x256xf32>
    %cst_9 = arith.constant 0.000000e+00 : f32
    %23 = vector.broadcast %cst_9 : f32 to vector<1x1x256xf32>
    %24 = arith.subf %23, %22 : vector<1x1x256xf32>
    %25 = math.exp %24 : vector<1x1x256xf32>
    %cst_10 = arith.constant 1.000000e+00 : f32
    %26 = vector.broadcast %cst_10 : f32 to vector<1x1x256xf32>
    %27 = arith.subf %26, %25 : vector<1x1x256xf32>
    %cst_11 = arith.constant 0.000000e+00 : f32
    %28 = vector.broadcast %cst_11 : f32 to vector<1x1x256xf32>
    %29 = arith.maximumf %27, %28 : vector<1x1x256xf32>
    %30 = arith.mulf %29, %29 : vector<1x1x256xf32>
    %cst_12 = arith.constant 2.500000e-01 : f32
    %31 = vector.broadcast %cst_12 : f32 to vector<1x1x256xf32>
    %32 = arith.mulf %31, %30 : vector<1x1x256xf32>
    %33 = arith.mulf %32, %22 : vector<1x1x256xf32>
    %cst_13 = arith.constant 0.000000e+00 : f32
    %34 = vector.broadcast %cst_13 : f32 to vector<1x1x256xf32>
    %35 = arith.select %17, %33, %34 : vector<1x1x256xi1>, vector<1x1x256xf32>
    %cst_14 = arith.constant dense<0.000000e+00> : vector<1x256xf32>
    %36 = vector.multi_reduction <add>, %35, %cst_14 [0] : vector<1x1x256xf32> to vector<1x256xf32>
    %37 = vector.extract_strided_slice %36 {offsets = [0, 0], sizes = [1, 128], strides = [1, 1]} : vector<1x256xf32> to vector<1x128xf32>
    %38 = vector.extract_strided_slice %36 {offsets = [0, 128], sizes = [1, 128], strides = [1, 1]} : vector<1x256xf32> to vector<1x128xf32>
    %39 = arith.addf %37, %38 : vector<1x128xf32>
    %c0_15 = arith.constant 0 : index
    %c0_16 = arith.constant 0 : index
    %c0_17 = arith.constant 0 : index
    %40 = vector.load %arg4[%c0_15, %c0_16, %c0_17] : memref<1x1x128xf32, #tpu.memory_space<vmem>>, vector<1x1x128xf32>
    %41 = vector.shape_cast %40 : vector<1x1x128xf32> to vector<1x128xf32>
    %42 = vector.shape_cast %39 : vector<1x128xf32> to vector<1x1x128xf32>
    tpu.vector_store %arg4[%c0_15, %c0_16, %c0_17], %42 {strides = array<i32>} : memref<1x1x128xf32, #tpu.memory_space<vmem>>, vector<1x1x128xf32>,
    return
  }
  func.func @transform_0(%arg0: i32, %arg1: i32) -> (i32, i32, i32) {
    %c0_i32 = arith.constant 0 : i32
    %c0_i32_0 = arith.constant 0 : i32
    return %arg0, %c0_i32, %arg1 : i32, i32, i32
  }
  func.func @transform_1(%arg0: i32, %arg1: i32) -> (i32, i32, i32) {
    %c0_i32 = arith.constant 0 : i32
    %c0_i32_0 = arith.constant 0 : i32
    return %arg0, %c0_i32, %arg1 : i32, i32, i32
  }
  func.func @transform_2(%arg0: i32, %arg1: i32) -> (i32, i32, i32) {
    %c0_i32 = arith.constant 0 : i32
    %c0_i32_0 = arith.constant 0 : i32
    return %arg0, %c0_i32, %arg1 : i32, i32, i32
  }
}

</mosaic_0001>

<bundles_post_ra>
// kernel: focal_loss.1
= control target key start
LH: loop header
LB: loop body
LE: loop exit
PB: predicated region body
PF: predicated region fallthrough
CT: control target
= control target key end

     0   :  { %s497_s9 = smov 0   ;;  %s499_s10 = smov 0   ;;  %s550_s0 = inlined_call_operand.vmem [shape: f32[2,4,256], index: 0, kind: input, shape index: {}]   ;;  %s551_s1 = inlined_call_operand.vmem [shape: s32[2,1,256], index: 1, kind: input, shape index: {}]   ;;  %s552_s2 = inlined_call_operand.vmem [shape: f32[2,1,128], index: 2, kind: output, shape index: {}]  }
   0x1   :  { %s501_s11 = smov 0  }
   0x2 LB: > { %s24_s12 = sadd.s32 1, %s476_s10  ;;  %p417_p0 = scmp.ge.s32.totalorder %s480_s11, 1  ;;  %s480_s11 = sphi %s501_s11, %s12_s11   ;;  %s476_s10 = sphi %s499_s10, %s554_s10   ;;  %s472_s9 = sphi %s497_s9, %s553_s9  }
   0x3   : > { %p26_p1 = scmp.ge.s32.totalorder %s24_s12, 2  ;;  %p149_p2 = scmp.lt.s32.totalorder %s480_s11, 3 }
   0x5   : > { %s556_s12 = smov (%p26_p1, %s24_s12), 0  ;;  %p150_p3 = pnand %p417_p0, %p149_p2 }
   0x6   : > { %p185_p4 = scmp.lt.s32.totalorder (!%p150_p3), %s472_s9, 1 }
   0x7   : > { %153 = sbr.rel (%p150_p3) target bundleno = 118 (0x76), region = 28 }
   0xc   : > { %s558_s9 = smov (!%p185_p4, %s472_s9), 1  ;;  %vm217_vm0 = vcmask 1043456   ;;  %v260_v22 = vlaneseq  ;;  %vm317_vm3 = vcmask 1040384  }
   0xd   : > { %s423_s13 = sshll.u32 %s558_s9, 3  ;;  %s420_s17 = sshll.u32 %s558_s9, 1 }
   0xe   : > { %s192_s16 = scalar_lea.vmem %s550_s0, %s423_s13  ;;  %s201_s20 = scalar_lea.vmem %s551_s1, %s420_s17  ;;  %v261_v28 = vshrl.u32 %v260_v22, 7 }
   0xf   : > { %v209_v0 = vld [vmem:[%s192_s16] sm:$0xff]  ;;  %s208_s23 = scalar_lea.vmem %s552_s2, %s558_s9 }
  0x10   : > { %212 = vst [vmem:[#allocation1] ss:$2 sm:$0xff] %v209_v0  ;;  %v528_v23 = vld [vmem:[%s201_s20] sm:$0x3] }
  0x11   : > { %v262_v31 = vperm.slane %v528_v23, 0  ;;  %v263_v32 = vperm.slane %v528_v23, 1  ;;  %vm287_vm4 = vcmp.ne.s32.totalorder %v528_v23, 4294967196 }
  0x13   : > { %vm264_vm1 = vcmp.eq.s32.totalorder %v261_v28, %v262_v31  ;;  %vm265_vm2 = vcmp.eq.s32.totalorder %v261_v28, %v263_v32 }
  0x17   : > { %v213_v1 = vld.sshfl [vmem:[#allocation1] sm:$0xff pattern:$0x75316420]  ;;  %v214_v2 = vld.sshfl [vmem:[#allocation1 + $0x8] sm:$0xff pattern:$0x75316420] }
  0x18   : > { %v218_v3 = vsel %vm217_vm0, %v213_v1, -inf  ;;  %v225_v4 = vsel %vm217_vm0, %v214_v2, -inf }
  0x19   : > { %v219_v5 = vrot.slane %v218_v3, 4  ;;  %v226_v6 = vrot.slane %v225_v4, 4 }
  0x1b   : > { %v220_v7 = vmax.f32 %v218_v3, %v219_v5  ;;  %v227_v8 = vmax.f32 %v225_v4, %v226_v6 }
  0x1d   : > { %v221_v9 = vrot.slane %v220_v7, 2  ;;  %v228_v10 = vrot.slane %v227_v8, 2 }
  0x1f   : > { %v222_v11 = vmax.f32 %v220_v7, %v221_v9  ;;  %v229_v12 = vmax.f32 %v227_v8, %v228_v10 }
  0x21   : > { %v223_v13 = vrot.slane %v222_v11, 1  ;;  %v230_v14 = vrot.slane %v229_v12, 1 }
  0x23   : > { %v231_v15 = vmax.f32 %v229_v12, %v230_v14  ;;  %v224_v16 = vmax.f32 %v222_v11, %v223_v13 }
  0x25   : > { %v234_v17 = vrot.slane %v231_v15, 4 }
  0x27   : > { %v235_v18 = vsel %vm217_vm0, %v224_v16, %v234_v17 }
  0x28   : > { %v237_v19 = vsub.f32 %v209_v0, %v235_v18 }
  0x2a   : > { %v238_v20 = vmul.f32 1.442695, %v237_v19 }
  0x2c   : > { %448 = vpow2.f32 %v238_v20 }
  0x32   : > { %v449_v21 = vpop.eup %448 }
  0x33   : > { %241 = vst [vmem:[#allocation1] ss:$2 sm:$0xff] %v449_v21 }
  0x3a   : > { %v242_v24 = vld.sshfl [vmem:[#allocation1] sm:$0xff pattern:$0x75316420]  ;;  %v243_v25 = vld.sshfl [vmem:[#allocation1 + $0x8] sm:$0xff pattern:$0x75316420] }
  0x3b   : > { %v246_v26 = vsel %vm217_vm0, %v242_v24, 0.0  ;;  %v253_v27 = vsel %vm217_vm0, %v243_v25, 0.0  ;;  %266 = vst [vmem:[#allocation1] ss:$2 sm:$0xff] %v209_v0 }
  0x3c   : > { %v247_v29 = vrot.slane %v246_v26, 4  ;;  %v254_v30 = vrot.slane %v253_v27, 4 }
  0x3e   : > { %v248_v33 = vadd.f32 %v247_v29, %v246_v26  ;;  %v255_v34 = vadd.f32 %v254_v30, %v253_v27 }
  0x40   : > { %v249_v35 = vrot.slane %v248_v33, 2  ;;  %v256_v36 = vrot.slane %v255_v34, 2 }
  0x42   : > { %v250_v37 = vadd.f32 %v249_v35, %v248_v33  ;;  %v257_v38 = vadd.f32 %v256_v36, %v255_v34  ;;  %v267_v39 = vld.sshfl [vmem:[#allocation1] sm:$0xff pattern:$0x75316420]  ;;  %v268_v40 = vld.sshfl [vmem:[#allocation1 + $0x8] sm:$0xff pattern:$0x75316420] }
  0x43   : > { %v271_v41 = vsel %vm264_vm1, %v267_v39, 0.0  ;;  %v272_v42 = vsel %vm265_vm2, %v268_v40, 0.0 }
  0x44   : > { %v251_v43 = vrot.slane %v250_v37, 1  ;;  %v258_v44 = vrot.slane %v257_v38, 1  ;;  %v273_v45 = vsel %vm217_vm0, %v271_v41, 0.0  ;;  %v280_v46 = vsel %vm217_vm0, %v272_v42, 0.0 }
  0x45   : > { %v274_v47 = vrot.slane %v273_v45, 4  ;;  %v281_v48 = vrot.slane %v280_v46, 4 }
  0x46   : > { %v252_v49 = vadd.f32 %v251_v43, %v250_v37  ;;  %v259_v50 = vadd.f32 %v258_v44, %v257_v38 }
  0x47   : > { %v275_v51 = vadd.f32 %v274_v47, %v273_v45  ;;  %v282_v52 = vadd.f32 %v281_v48, %v280_v46 }
  0x48   : > { %450 = vlog2.f32 %v252_v49 }
  0x49   : > { %452 = vlog2.f32 %v259_v50  ;;  %v276_v53 = vrot.slane %v275_v51, 2  ;;  %v283_v54 = vrot.slane %v282_v52, 2 }
  0x4b   : > { %v277_v55 = vadd.f32 %v276_v53, %v275_v51  ;;  %v284_v56 = vadd.f32 %v283_v54, %v282_v52 }
  0x4d   : > { %v278_v57 = vrot.slane %v277_v55, 1  ;;  %v285_v59 = vrot.slane %v284_v56, 1 }
  0x4e   : > { %v451_v58 = vpop.eup %450 }
  0x4f   : > { %v453_v60 = vpop.eup %452  ;;  %v289_v61 = vmul.f32 0.6931472, %v451_v58  ;;  %v279_v63 = vadd.f32 %v278_v57, %v277_v55  ;;  %v286_v1 = vadd.f32 %v285_v59, %v284_v56 }
  0x50   : > { %v291_v62 = vmul.f32 0.6931472, %v453_v60 }
  0x51   : > { %v292_v0 = vadd.f32 %v289_v61, %v224_v16 }
  0x52   : > { %v293_v2 = vadd.f32 %v291_v62, %v231_v15 }
  0x53   : > { %v294_v3 = vsub.f32 %v292_v0, %v279_v63 }
  0x54   : > { %v295_v4 = vsub.f32 %v293_v2, %v286_v1 }
  0x55   : > { %v296_v5 = vmax.f32 %v294_v3, 0.0 }
  0x56   : > { %v297_v6 = vmax.f32 %v295_v4, 0.0 }
  0x57   : > { %v298_v7 = vsub.f32 0.0, %v296_v5 }
  0x58   : > { %v299_v8 = vsub.f32 0.0, %v297_v6 }
  0x59   : > { %v300_v9 = vmul.f32 1.442695, %v298_v7 }
  0x5a   : > { %v302_v10 = vmul.f32 1.442695, %v299_v8 }
  0x5b   : > { %454 = vpow2.f32 %v300_v9 }
  0x5c   : > { %456 = vpow2.f32 %v302_v10 }
  0x61   : > { %v455_v11 = vpop.eup %454 }
  0x62   : > { %v457_v12 = vpop.eup %456  ;;  %v304_v13 = vsub.f32 1.0, %v455_v11 }
  0x63   : > { %v305_v14 = vsub.f32 1.0, %v457_v12 }
  0x64   : > { %v306_v17 = vmax.f32 %v304_v13, 0.0 }
  0x65   : > { %v307_v18 = vmax.f32 %v305_v14, 0.0 }
  0x66   : > { %v308_v16 = vmul.f32 %v306_v17, %v306_v17 }
  0x67   : > { %v309_v19 = vmul.f32 %v307_v18, %v307_v18 }
  0x68   : > { %v310_v15 = vmul.f32 0.25, %v308_v16 }
  0x69   : > { %v311_v20 = vmul.f32 0.25, %v309_v19 }
  0x6a   : > { %v312_v22 = vmul.f32 %v310_v15, %v296_v5 }
  0x6b   : > { %v313_v21 = vmul.f32 %v311_v20, %v297_v6 }
  0x6d   : > { %v316_v24 = vrot.slane %v313_v21, 7 }
  0x6f   : > { %v318_v25 = vsel %vm317_vm3, %v312_v22, %v316_v24 }
  0x70   : > { %v320_v26 = vsel %vm287_vm4, %v318_v25, 0.0 }
  0x71   : > { %v323_v27 = vrot.slane %v320_v26, 1 }
  0x73   : > { %v325_v28 = vadd.f32 %v323_v27, %v320_v26 }
  0x75   : > { %326 = vst [vmem:[%s208_s23] sm:$0x1] %v325_v28 }
  0x76 PF: > { %s12_s11 = sadd.s32 1, %s480_s11   ;;  %s553_s9 = smov %s476_s10 }
  0x77   : > { %p9_p5 = scmp.ge.s32.totalorder %s12_s11, 4   ;;  %s554_s10 = smov %s556_s12 }
  0x79   :  { %11 = sbr.rel (!%p9_p5) target bundleno = 2 (0x2), region = 61 }

</bundles_post_ra>
